<compile_context>
chip_gen: v6e
topology: v6e:2x2x1
jax: 0.10.0
libtpu: 0.0.40
codegen_flags: <defaults>
</compile_context>

<pallas_src>
import functools

import jax
import jax.numpy as jnp
from jax.experimental import pallas as pl
from jax.experimental.pallas import tpu as pltpu


def _graph_residual_kernel(v_ref, a_ref, w_ref, lb_ref, bias_ref, out_ref, *,
                           adj_chans):
    # v_ref    : (b*N, C)        node features, whole batch folded into M
    # a_ref    : (L, b*N, b*N)   channel-major, batch-block-diagonal adjacency
    # w_ref    : (L, C, C)       stacked Linear weights, pre-transposed (in, out)
    # lb_ref   : (L, C)          stacked Linear biases
    # bias_ref : (1, C)          final residual bias
    # out_ref  : (b*N, C)
    v = v_ref[...]                                            # f32
    for i in range(adj_chans):            # static unroll; strictly sequential in V
        # Linear_i over the folded batch: one (b*N, C) @ (C, C) MXU pass.
        hs = jnp.dot(v, w_ref[i], preferred_element_type=jnp.float32) + lb_ref[i]
        hs = jnp.maximum(hs, 0.0)                             # relu (VPU)
        # Graph aggregation: one block-diagonal (b*N, b*N) @ (b*N, C) MXU pass
        # (cross-batch blocks are exact zeros -> identical result to per-batch bmm).
        v = v + jnp.dot(a_ref[i], hs, preferred_element_type=jnp.float32)
    out_ref[...] = (v + bias_ref[...]).astype(out_ref.dtype)


@jax.jit
def graph_residual_cnn_layer(V, A, W_t, lin_b, bias):
    """V: [b, N, C], A: [b, N, L, N], W_t: [L, C, C] (in, out), lin_b: [L, C], bias: [C]."""
    b, N, C = V.shape
    L = A.shape[2]

    V2 = V.reshape(b * N, C)

    # Wrapper-side relayout of A (tiny tensor -> effectively free):
    # channel-major + batch-block-diagonal, so each channel step in-kernel is a
    # single aligned (b*N, b*N) matmul with no lane slicing or concat.
    A_ch = jnp.transpose(A, (2, 0, 1, 3))                     # (L, b, N, N)
    eye_b = jnp.eye(b, dtype=A.dtype)                         # (b, b)
    A_bd = jnp.einsum("lbnm,bk->lbnkm", A_ch, eye_b).reshape(L, b * N, b * N)

    bias2 = bias.reshape(1, C)

    kernel = functools.partial(_graph_residual_kernel, adj_chans=L)

    vmem_spec = pl.BlockSpec(memory_space=pltpu.MemorySpace.VMEM)
    out = pl.pallas_call(
        kernel,
        out_shape=jax.ShapeDtypeStruct((b * N, C), V.dtype),
        in_specs=[vmem_spec, vmem_spec, vmem_spec, vmem_spec, vmem_spec],
        out_specs=vmem_spec,
    )(V2, A_bd, W_t, lin_b, bias2)
    return out.reshape(b, N, C)


def _reference(V, A, W_t, lin_b, bias):
    # pure-JAX reference of the PyTorch forward
    L = W_t.shape[0]
    for i in range(L):
        hs = jax.nn.relu(V @ W_t[i] + lin_b[i])               # Linear_i + relu
        a = A[:, :, i, :]                                     # [b, N, N]
        V = V + jnp.einsum("bnm,bmc->bnc", a, hs)
    return V + bias


if __name__ == "__main__":
    key = jax.random.PRNGKey(0)
    b, N, C, L = 2, 16, 32, 4                                 # small but TPU-friendly

    k_v, k_a, k_w, k_lb = jax.random.split(key, 4)
    V = jax.random.normal(k_v, (b, N, C), dtype=jnp.float32)
    A = jax.random.normal(k_a, (b, N, L, N), dtype=jnp.float32)

    # Deterministic parameter init (shapes from nn.Linear(C, C) x L + bias(C)).
    # PyTorch-Linear-like uniform(-1/sqrt(C), 1/sqrt(C)); exact values synthetic.
    bound = 1.0 / (C ** 0.5)
    # weights pre-transposed: W_t[i] is (in=C, out=C) so V @ W_t[i] == Linear_i(V)
    W_t = jax.random.uniform(k_w, (L, C, C), minval=-bound, maxval=bound, dtype=jnp.float32)
    lin_b = jax.random.uniform(k_lb, (L, C), minval=-bound, maxval=bound, dtype=jnp.float32)
    bias = jnp.full((C,), 0.01, dtype=jnp.float32)            # reset_parameters()

    out = graph_residual_cnn_layer(V, A, W_t, lin_b, bias)
    out = jax.block_until_ready(out)

    ref = _reference(V, A, W_t, lin_b, bias)
    assert out.shape == (b, N, C)
    assert jnp.allclose(out, ref, atol=1e-4, rtol=1e-4), "mismatch vs reference"

    print("KERNEL_OK")
</pallas_src>

<mosaic_0001>
module attributes {stable_mosaic.version = 11 : i64} {
  func.func @_graph_residual_kernel(%arg0: memref<32x32xf32, #tpu.memory_space<vmem>>, %arg1: memref<4x32x32xf32, #tpu.memory_space<vmem>>, %arg2: memref<4x32x32xf32, #tpu.memory_space<vmem>>, %arg3: memref<4x32xf32, #tpu.memory_space<vmem>>, %arg4: memref<1x32xf32, #tpu.memory_space<vmem>>, %arg5: memref<32x32xf32, #tpu.memory_space<vmem>>) attributes {dimension_semantics = [], scalar_prefetch = 0 : i64, scratch_operands = 0 : i64, tpu.core_type = #tpu.core_type<tc>} {
    %c0 = arith.constant 0 : index
    %c0_0 = arith.constant 0 : index
    %0 = vector.load %arg0[%c0, %c0_0] : memref<32x32xf32, #tpu.memory_space<vmem>>, vector<32x32xf32>
    %c0_1 = arith.constant 0 : index
    %c0_2 = arith.constant 0 : index
    %c0_3 = arith.constant 0 : index
    %1 = vector.load %arg2[%c0_1, %c0_2, %c0_3] : memref<4x32x32xf32, #tpu.memory_space<vmem>>, vector<1x32x32xf32>
    %2 = vector.shape_cast %1 : vector<1x32x32xf32> to vector<32x32xf32>
    %cst = arith.constant dense<0.000000e+00> : vector<32x32xf32>
    %3 = tpu.matmul %0, %2, %cst {dimension_numbers = #tpu.dot_dimension_numbers<[1], [0], [0], [1], [0, 0, 1, 1], [], []>} : vector<32x32xf32>, vector<32x32xf32>, vector<32x32xf32> -> vector<32x32xf32>
    %c0_4 = arith.constant 0 : index
    %c0_5 = arith.constant 0 : index
    %4 = vector.load %arg3[%c0_4, %c0_5] : memref<4x32xf32, #tpu.memory_space<vmem>>, vector<1x32xf32>
    %5 = vector.shape_cast %4 : vector<1x32xf32> to vector<32xf32>
    %6 = vector.shape_cast %5 : vector<32xf32> to vector<1x32xf32>
    %7 = vector.broadcast %6 : vector<1x32xf32> to vector<32x32xf32>
    %8 = arith.addf %3, %7 : vector<32x32xf32>
    %cst_6 = arith.constant 0.000000e+00 : f32
    %9 = vector.broadcast %cst_6 : f32 to vector<32x32xf32>
    %10 = arith.maximumf %8, %9 : vector<32x32xf32>
    %c0_7 = arith.constant 0 : index
    %c0_8 = arith.constant 0 : index
    %c0_9 = arith.constant 0 : index
    %11 = vector.load %arg1[%c0_7, %c0_8, %c0_9] : memref<4x32x32xf32, #tpu.memory_space<vmem>>, vector<1x32x32xf32>
    %12 = vector.shape_cast %11 : vector<1x32x32xf32> to vector<32x32xf32>
    %cst_10 = arith.constant dense<0.000000e+00> : vector<32x32xf32>
    %13 = tpu.matmul %12, %10, %cst_10 {dimension_numbers = #tpu.dot_dimension_numbers<[1], [0], [0], [1], [0, 0, 1, 1], [], []>} : vector<32x32xf32>, vector<32x32xf32>, vector<32x32xf32> -> vector<32x32xf32>
    %14 = arith.addf %0, %13 : vector<32x32xf32>
    %c1 = arith.constant 1 : index
    %c0_11 = arith.constant 0 : index
    %c0_12 = arith.constant 0 : index
    %15 = vector.load %arg2[%c1, %c0_11, %c0_12] : memref<4x32x32xf32, #tpu.memory_space<vmem>>, vector<1x32x32xf32>
    %16 = vector.shape_cast %15 : vector<1x32x32xf32> to vector<32x32xf32>
    %cst_13 = arith.constant dense<0.000000e+00> : vector<32x32xf32>
    %17 = tpu.matmul %14, %16, %cst_13 {dimension_numbers = #tpu.dot_dimension_numbers<[1], [0], [0], [1], [0, 0, 1, 1], [], []>} : vector<32x32xf32>, vector<32x32xf32>, vector<32x32xf32> -> vector<32x32xf32>
    %c1_14 = arith.constant 1 : index
    %c0_15 = arith.constant 0 : index
    %18 = vector.load %arg3[%c1_14, %c0_15] : memref<4x32xf32, #tpu.memory_space<vmem>>, vector<1x32xf32>
    %19 = vector.shape_cast %18 : vector<1x32xf32> to vector<32xf32>
    %20 = vector.shape_cast %19 : vector<32xf32> to vector<1x32xf32>
    %21 = vector.broadcast %20 : vector<1x32xf32> to vector<32x32xf32>
    %22 = arith.addf %17, %21 : vector<32x32xf32>
    %cst_16 = arith.constant 0.000000e+00 : f32
    %23 = vector.broadcast %cst_16 : f32 to vector<32x32xf32>
    %24 = arith.maximumf %22, %23 : vector<32x32xf32>
    %c1_17 = arith.constant 1 : index
    %c0_18 = arith.constant 0 : index
    %c0_19 = arith.constant 0 : index
    %25 = vector.load %arg1[%c1_17, %c0_18, %c0_19] : memref<4x32x32xf32, #tpu.memory_space<vmem>>, vector<1x32x32xf32>
    %26 = vector.shape_cast %25 : vector<1x32x32xf32> to vector<32x32xf32>
    %cst_20 = arith.constant dense<0.000000e+00> : vector<32x32xf32>
    %27 = tpu.matmul %26, %24, %cst_20 {dimension_numbers = #tpu.dot_dimension_numbers<[1], [0], [0], [1], [0, 0, 1, 1], [], []>} : vector<32x32xf32>, vector<32x32xf32>, vector<32x32xf32> -> vector<32x32xf32>
    %28 = arith.addf %14, %27 : vector<32x32xf32>
    %c2 = arith.constant 2 : index
    %c0_21 = arith.constant 0 : index
    %c0_22 = arith.constant 0 : index
    %29 = vector.load %arg2[%c2, %c0_21, %c0_22] : memref<4x32x32xf32, #tpu.memory_space<vmem>>, vector<1x32x32xf32>
    %30 = vector.shape_cast %29 : vector<1x32x32xf32> to vector<32x32xf32>
    %cst_23 = arith.constant dense<0.000000e+00> : vector<32x32xf32>
    %31 = tpu.matmul %28, %30, %cst_23 {dimension_numbers = #tpu.dot_dimension_numbers<[1], [0], [0], [1], [0, 0, 1, 1], [], []>} : vector<32x32xf32>, vector<32x32xf32>, vector<32x32xf32> -> vector<32x32xf32>
    %c2_24 = arith.constant 2 : index
    %c0_25 = arith.constant 0 : index
    %32 = vector.load %arg3[%c2_24, %c0_25] : memref<4x32xf32, #tpu.memory_space<vmem>>, vector<1x32xf32>
    %33 = vector.shape_cast %32 : vector<1x32xf32> to vector<32xf32>
    %34 = vector.shape_cast %33 : vector<32xf32> to vector<1x32xf32>
    %35 = vector.broadcast %34 : vector<1x32xf32> to vector<32x32xf32>
    %36 = arith.addf %31, %35 : vector<32x32xf32>
    %cst_26 = arith.constant 0.000000e+00 : f32
    %37 = vector.broadcast %cst_26 : f32 to vector<32x32xf32>
    %38 = arith.maximumf %36, %37 : vector<32x32xf32>
    %c2_27 = arith.constant 2 : index
    %c0_28 = arith.constant 0 : index
    %c0_29 = arith.constant 0 : index
    %39 = vector.load %arg1[%c2_27, %c0_28, %c0_29] : memref<4x32x32xf32, #tpu.memory_space<vmem>>, vector<1x32x32xf32>
    %40 = vector.shape_cast %39 : vector<1x32x32xf32> to vector<32x32xf32>
    %cst_30 = arith.constant dense<0.000000e+00> : vector<32x32xf32>
    %41 = tpu.matmul %40, %38, %cst_30 {dimension_numbers = #tpu.dot_dimension_numbers<[1], [0], [0], [1], [0, 0, 1, 1], [], []>} : vector<32x32xf32>, vector<32x32xf32>, vector<32x32xf32> -> vector<32x32xf32>
    %42 = arith.addf %28, %41 : vector<32x32xf32>
    %c3 = arith.constant 3 : index
    %c0_31 = arith.constant 0 : index
    %c0_32 = arith.constant 0 : index
    %43 = vector.load %arg2[%c3, %c0_31, %c0_32] : memref<4x32x32xf32, #tpu.memory_space<vmem>>, vector<1x32x32xf32>
    %44 = vector.shape_cast %43 : vector<1x32x32xf32> to vector<32x32xf32>
    %cst_33 = arith.constant dense<0.000000e+00> : vector<32x32xf32>
    %45 = tpu.matmul %42, %44, %cst_33 {dimension_numbers = #tpu.dot_dimension_numbers<[1], [0], [0], [1], [0, 0, 1, 1], [], []>} : vector<32x32xf32>, vector<32x32xf32>, vector<32x32xf32> -> vector<32x32xf32>
    %c3_34 = arith.constant 3 : index
    %c0_35 = arith.constant 0 : index
    %46 = vector.load %arg3[%c3_34, %c0_35] : memref<4x32xf32, #tpu.memory_space<vmem>>, vector<1x32xf32>
    %47 = vector.shape_cast %46 : vector<1x32xf32> to vector<32xf32>
    %48 = vector.shape_cast %47 : vector<32xf32> to vector<1x32xf32>
    %49 = vector.broadcast %48 : vector<1x32xf32> to vector<32x32xf32>
    %50 = arith.addf %45, %49 : vector<32x32xf32>
    %cst_36 = arith.constant 0.000000e+00 : f32
    %51 = vector.broadcast %cst_36 : f32 to vector<32x32xf32>
    %52 = arith.maximumf %50, %51 : vector<32x32xf32>
    %c3_37 = arith.constant 3 : index
    %c0_38 = arith.constant 0 : index
    %c0_39 = arith.constant 0 : index
    %53 = vector.load %arg1[%c3_37, %c0_38, %c0_39] : memref<4x32x32xf32, #tpu.memory_space<vmem>>, vector<1x32x32xf32>
    %54 = vector.shape_cast %53 : vector<1x32x32xf32> to vector<32x32xf32>
    %cst_40 = arith.constant dense<0.000000e+00> : vector<32x32xf32>
    %55 = tpu.matmul %54, %52, %cst_40 {dimension_numbers = #tpu.dot_dimension_numbers<[1], [0], [0], [1], [0, 0, 1, 1], [], []>} : vector<32x32xf32>, vector<32x32xf32>, vector<32x32xf32> -> vector<32x32xf32>
    %56 = arith.addf %42, %55 : vector<32x32xf32>
    %c0_41 = arith.constant 0 : index
    %c0_42 = arith.constant 0 : index
    %57 = vector.load %arg4[%c0_41, %c0_42] : memref<1x32xf32, #tpu.memory_space<vmem>>, vector<1x32xf32>
    %58 = vector.broadcast %57 : vector<1x32xf32> to vector<32x32xf32>
    %59 = arith.addf %56, %58 : vector<32x32xf32>
    %c0_43 = arith.constant 0 : index
    %c0_44 = arith.constant 0 : index
    %60 = vector.load %arg5[%c0_43, %c0_44] : memref<32x32xf32, #tpu.memory_space<vmem>>, vector<32x32xf32>
    tpu.vector_store %arg5[%c0_43, %c0_44], %59 {strides = array<i32>} : memref<32x32xf32, #tpu.memory_space<vmem>>, vector<32x32xf32>,
    return
  }
}

</mosaic_0001>

<bundles_post_ra>
// kernel: graph_residual_cnn_layer.1
= control target key start
LH: loop header
LB: loop body
LE: loop exit
PB: predicated region body
PF: predicated region fallthrough
CT: control target
= control target key end

     0   :  { %vm34_vm0 = vcmask 261120   ;;  %s1380_s0 = inlined_call_operand.vmem [shape: f32[32,32], index: 0, kind: input, shape index: {}]   ;;  %s1381_s1 = inlined_call_operand.vmem [shape: f32[4,32,32], index: 1, kind: input, shape index: {}]   ;;  %s1382_s2 = inlined_call_operand.vmem [shape: f32[4,32,32], index: 2, kind: input, shape index: {}]   ;;  %s1383_s3 = inlined_call_operand.vmem [shape: f32[4,32], index: 3, kind: input, shape index: {}]   ;;  %s1384_s4 = inlined_call_operand.vmem [shape: f32[1,32], index: 4, kind: input, shape index: {}]   ;;  %s1385_s5 = inlined_call_operand.hbm [shape: f32[32,32], index: 5, kind: output, shape index: {}]  }
   0x1   :  { %v28_v0 = vld [vmem:[%s1382_s2 + $0x18] sm:$0xff]  ;;  %v27_v1 = vld [vmem:[%s1382_s2 + $0x10] sm:$0xff]  ;;  %v21_v2 = vld [vmem:[%s1380_s0] sm:$0xff] }
   0x2   :  { %1048 = vmatprep.subr.mxu0 %v28_v0  ;;  %v26_v3 = vld [vmem:[%s1382_s2 + $0x8] sm:$0xff]  ;;  %1056 = vmatprep.mubr.msk.f32.mxu0 %vm34_vm0, %v21_v2 }
   0x3   :  { %1049 = vmatpush3.msra.mxu0 %v28_v0 }
   0x4   :  { %10 = vsyncpa [#allocation3], 0  ;;  %1050 = vmatprep.subr.mxu0 %v27_v1  ;;  %v25_v4 = vld [vmem:[%s1382_s2] sm:$0xff]  ;;  %v22_v5 = vld [vmem:[%s1380_s0 + $0x8] sm:$0xff]  ;;  %s1185_s20 = smov [#allocation2]  }
   0x5   :  { %1051 = vmatpush3.msra.mxu0 %v27_v1  ;;  %v23_v6 = vld [vmem:[%s1380_s0 + $0x10] sm:$0xff]  ;;  %v24_v7 = vld [vmem:[%s1380_s0 + $0x18] sm:$0xff]  ;;  %v136_v8 = vld [vmem:[%s1381_s1] sm:$0xff]  ;;  %s912_s21 = sshll.u32 %s1185_s20, 4  ;;  %s913_s21 = int_to_ptr.vmem [resolvable:$true] %s912_s21 }
   0x6   :  { %1052 = vmatprep.subr.mxu0 %v26_v3  ;;  %1070 = vmatprep.mubr.msk.f32.mxu1 %vm34_vm0, %v136_v8  ;;  %v935_v9 = vld [vmem:[%s1382_s2 + $0x38] sm:$0xff]  ;;  %v923_v12 = vld [vmem:[%s1383_s3] ss:$0 sm:$0xff]  ;;  %v137_v23 = vld [vmem:[%s1381_s1 + $0x8] sm:$0xff]  ;;  %p1168_p1 = scmp.lt.s32.totalorder %s913_s21, %s913_s21 }
   0x7   :  { %1053 = vmatpush3.msra.mxu0 %v26_v3  ;;  %v138_v24 = vld [vmem:[%s1381_s1 + $0x10] sm:$0xff]  ;;  %v139_v25 = vld [vmem:[%s1381_s1 + $0x18] sm:$0xff]  ;;  %v933_v27 = vld [vmem:[%s1382_s2 + $0x28] sm:$0xff] }
   0x8   :  { %1054 = vmatprep.subr.mxu0 %v25_v4  ;;  %v934_v26 = vld [vmem:[%s1382_s2 + $0x30] sm:$0xff]  ;;  %v932_v28 = vld [vmem:[%s1382_s2 + $0x20] sm:$0xff]  ;;  %v952_v38 = vld [vmem:[%s1382_s2 + $0x58] sm:$0xff] }
   0x9   :  { %1055 = vmatpush3.msra.mxu0 %v25_v4  ;;  %v941_v37 = vld [vmem:[%s1381_s1 + $0x20] sm:$0xff]  ;;  %v942_v52 = vld [vmem:[%s1381_s1 + $0x28] sm:$0xff]  ;;  %v943_v53 = vld [vmem:[%s1381_s1 + $0x30] sm:$0xff] }
   0xa   :  { %1057 = vmatmul.mubr.msk.f32.vlgmr.msra.gmra.mxu0 %vm34_vm0, %v22_v5  ;;  %1076 = vmatprep.subr.mxu0 %v935_v9  ;;  %v936_v41 = vld [vmem:[%s1383_s3 + $0x1] ss:$0 sm:$0xff]  ;;  %v944_v54 = vld [vmem:[%s1381_s1 + $0x38] sm:$0xff]  ;;  %v951_v55 = vld [vmem:[%s1382_s2 + $0x50] sm:$0xff] }
   0xb   :  { %1059 = vmatprep.mubr.msk.f32.mxu0 %vm34_vm0, %v23_v6  ;;  %1077 = vmatpush3.msra.mxu0 %v935_v9  ;;  %v950_v56 = vld [vmem:[%s1382_s2 + $0x48] sm:$0xff]  ;;  %v949_v57 = vld [vmem:[%s1382_s2 + $0x40] sm:$0xff]  ;;  %v969_v3 = vld [vmem:[%s1382_s2 + $0x78] sm:$0xff] }
   0xc   :  { %1078 = vmatprep.subr.mxu0 %v934_v26 }
   0xd   :  { %1079 = vmatpush3.msra.mxu0 %v934_v26 }
   0xe   :  { %1060 = vmatmul.mubr.msk.f32.gmra.mxu0 %vm34_vm0, %v24_v7  ;;  %1080 = vmatprep.subr.mxu0 %v933_v27 }
   0xf   :  { %1081 = vmatpush3.msra.mxu0 %v933_v27 }
  0x10   :  { %1082 = vmatprep.subr.mxu0 %v932_v28 }
  0x11   :  { %1083 = vmatpush3.msra.mxu0 %v932_v28 }
  0x12   :  { %1104 = vmatprep.subr.mxu0 %v952_v38 }
  0xca   :  { %v1058_v10 = vpop.f32.mrf.mxu0 }
  0xcb   :  { %v119_v16 = vadd.f32 %v1058_v10, %v923_v12 }
  0xcc   :  { %v113_v11 = vpop.f32.mrf.mxu0 }
  0xcd   :  { %v114_v19 = vadd.f32 %v923_v12, %v113_v11  ;;  %v133_v21 = vmax.f32 %v119_v16, 0.0 }
  0xce   :  { %v1061_v13 = vpop.f32.mrf.mxu0 }
  0xcf   :  { %v129_v14 = vadd.f32 %v1061_v13, %v923_v12  ;;  %v132_v22 = vmax.f32 %v114_v19, 0.0  ;;  %v961_v19 = vld [vmem:[%s1381_s1 + $0x58] sm:$0xff] }
  0xd0   :  { %v123_v15 = vpop.f32.mrf.mxu0 }
  0xd1   :  { %v135_v17 = vmax.f32 %v129_v14, 0.0  ;;  %v124_v18 = vadd.f32 %v923_v12, %v123_v15 }
  0xd3   :  { %v134_v20 = vmax.f32 %v124_v18, 0.0  ;;  %1062 = vmatprep.subr.mxu1 %v135_v17  ;;  %v960_v18 = vld [vmem:[%s1381_s1 + $0x50] sm:$0xff] }
  0xd4   :  { %1063 = vmatpush3.msra.mxu1 %v135_v17  ;;  %v959_v17 = vld [vmem:[%s1381_s1 + $0x48] sm:$0xff] }
  0xd5   :  { %1064 = vmatprep.subr.mxu1 %v134_v20 }
  0xd6   :  { %1065 = vmatpush3.msra.mxu1 %v134_v20  ;;  %v968_v20 = vld [vmem:[%s1382_s2 + $0x70] sm:$0xff] }
  0xd7   :  { %1066 = vmatprep.subr.mxu1 %v133_v21 }
  0xd8   :  { %1067 = vmatpush3.msra.mxu1 %v133_v21  ;;  %v967_v21 = vld [vmem:[%s1382_s2 + $0x68] sm:$0xff] }
  0xd9   :  { %1068 = vmatprep.subr.mxu1 %v132_v22 }
  0xda   :  { %1069 = vmatpush3.msra.mxu1 %v132_v22  ;;  %v966_v22 = vld [vmem:[%s1382_s2 + $0x60] sm:$0xff] }
  0xdb   :  { %1071 = vmatmul.mubr.msk.f32.vlgmr.msra.gmra.mxu1 %vm34_vm0, %v137_v23 }
  0xdc   :  { %1073 = vmatprep.mubr.msk.f32.mxu1 %vm34_vm0, %v138_v24 }
  0xdf   :  { %1074 = vmatmul.mubr.msk.f32.gmra.mxu1 %vm34_vm0, %v139_v25 }
  0xe0   :  { %1098 = vmatprep.mubr.msk.f32.mxu1 %vm34_vm0, %v941_v37 }
 0x19b   :  { %v1072_v29 = vpop.f32.mrf.mxu1 }
 0x19c   :  { %v238_v32 = vadd.f32 %v1072_v29, %v22_v5 }
 0x19d   :  { %v218_v30 = vpop.f32.mrf.mxu1 }
 0x19e   :  { %v237_v31 = vadd.f32 %v218_v30, %v21_v2  ;;  %v958_v2 = vld [vmem:[%s1381_s1 + $0x40] sm:$0xff] }
 0x19f   :  { %v1075_v33 = vpop.f32.mrf.mxu1 }
 0x1a0   :  { %1084 = vmatprep.mubr.msk.f32.mxu0 %vm34_vm0, %v237_v31  ;;  %v240_v36 = vadd.f32 %v1075_v33, %v24_v7 }
 0x1a1   :  { %v228_v34 = vpop.f32.mrf.mxu1  ;;  %1085 = vmatmul.mubr.msk.f32.vlgmr.msra.gmra.mxu0 %vm34_vm0, %v238_v32 }
 0x1a2   :  { %v239_v35 = vadd.f32 %v228_v34, %v23_v6  ;;  %1105 = vmatpush3.msra.mxu0 %v952_v38  ;;  %v953_v6 = vld [vmem:[%s1383_s3 + $0x2] ss:$0 sm:$0xff]  ;;  %v970_v34 = vld [vmem:[%s1383_s3 + $0x3] ss:$0 sm:$0xff] }
 0x1a3   :  { %1106 = vmatprep.subr.mxu0 %v951_v55 }
 0x1a4   :  { %1087 = vmatprep.mubr.msk.f32.mxu0 %vm34_vm0, %v239_v35  ;;  %1107 = vmatpush3.msra.mxu0 %v951_v55 }
 0x1a5   :  { %1088 = vmatmul.mubr.msk.f32.gmra.mxu0 %vm34_vm0, %v240_v36  ;;  %1108 = vmatprep.subr.mxu0 %v950_v56 }
 0x1a6   :  { %1109 = vmatpush3.msra.mxu0 %v950_v56 }
 0x1a7   :  { %1110 = vmatprep.subr.mxu0 %v949_v57 }
 0x1a8   :  { %1111 = vmatpush3.msra.mxu0 %v949_v57 }
 0x1a9   :  { %1132 = vmatprep.subr.mxu0 %v969_v3 }
 0x261   :  { %v1086_v39 = vpop.f32.mrf.mxu0 }
 0x262   :  { %v335_v45 = vadd.f32 %v1086_v39, %v936_v41 }
 0x263   :  { %v329_v40 = vpop.f32.mrf.mxu0 }
 0x264   :  { %v330_v48 = vadd.f32 %v936_v41, %v329_v40  ;;  %v349_v50 = vmax.f32 %v335_v45, 0.0  ;;  %v976_v45 = vld [vmem:[%s1381_s1 + $0x68] sm:$0xff] }
 0x265   :  { %v1089_v42 = vpop.f32.mrf.mxu0 }
 0x266   :  { %v345_v43 = vadd.f32 %v1089_v42, %v936_v41  ;;  %v348_v51 = vmax.f32 %v330_v48, 0.0 }
 0x267   :  { %v339_v44 = vpop.f32.mrf.mxu0 }
 0x268   :  { %v351_v46 = vmax.f32 %v345_v43, 0.0  ;;  %v340_v47 = vadd.f32 %v936_v41, %v339_v44 }
 0x26a   :  { %v350_v49 = vmax.f32 %v340_v47, 0.0  ;;  %1090 = vmatprep.subr.mxu1 %v351_v46  ;;  %v978_v47 = vld [vmem:[%s1381_s1 + $0x78] sm:$0xff] }
 0x26b   :  { %1091 = vmatpush3.msra.mxu1 %v351_v46  ;;  %v977_v46 = vld [vmem:[%s1381_s1 + $0x70] sm:$0xff] }
 0x26c   :  { %1092 = vmatprep.subr.mxu1 %v350_v49 }
 0x26d   :  { %1093 = vmatpush3.msra.mxu1 %v350_v49  ;;  %v983_v49 = vld [vmem:[%s1384_s4] ss:$0 sm:$0xff] }
 0x26e   :  { %1094 = vmatprep.subr.mxu1 %v349_v50 }
 0x26f   :  { %1095 = vmatpush3.msra.mxu1 %v349_v50 }
 0x270   :  { %1096 = vmatprep.subr.mxu1 %v348_v51 }
 0x271   :  { %1097 = vmatpush3.msra.mxu1 %v348_v51 }
 0x272   :  { %1099 = vmatmul.mubr.msk.f32.vlgmr.msra.gmra.mxu1 %vm34_vm0, %v942_v52 }
 0x273   :  { %1101 = vmatprep.mubr.msk.f32.mxu1 %vm34_vm0, %v943_v53 }
 0x276   :  { %1102 = vmatmul.mubr.msk.f32.gmra.mxu1 %vm34_vm0, %v944_v54 }
 0x277   :  { %1126 = vmatprep.mubr.msk.f32.mxu1 %vm34_vm0, %v958_v2 }
 0x332   :  { %v1100_v58 = vpop.f32.mrf.mxu1 }
 0x333   :  { %v455_v61 = vadd.f32 %v1100_v58, %v238_v32 }
 0x334   :  { %v435_v59 = vpop.f32.mrf.mxu1 }
 0x335   :  { %v454_v60 = vadd.f32 %v435_v59, %v237_v31  ;;  %v975_v31 = vld [vmem:[%s1381_s1 + $0x60] sm:$0xff]  ;;  %s1163_s1 = scalar_lea.vmem %s913_s21, 512 }
 0x336   :  { %v1103_v62 = vpop.f32.mrf.mxu1  ;;  %p1164_p0 = scmp.ne.s32.totalorder %s913_s21, %s1163_s1  ;;  %p1169_p2 = scmp.lt.s32.totalorder %s1163_s1, %s1163_s1 }
 0x337   :  { %1112 = vmatprep.mubr.msk.f32.mxu0 %vm34_vm0, %v454_v60  ;;  %v457_v1 = vadd.f32 %v1103_v62, %v240_v36 }
 0x338   :  { %v445_v63 = vpop.f32.mrf.mxu1  ;;  %1113 = vmatmul.mubr.msk.f32.vlgmr.msra.gmra.mxu0 %vm34_vm0, %v455_v61  ;;  %p1170_p3 = por %p1169_p2, %p1168_p1 }
 0x339   :  { %v456_v0 = vadd.f32 %v445_v63, %v239_v35  ;;  %1133 = vmatpush3.msra.mxu0 %v969_v3 }
 0x33a   :  { %1134 = vmatprep.subr.mxu0 %v968_v20  ;;  %p1171_p4 = pnand %p1170_p3, %p1164_p0 }
 0x33b   :  { %1115 = vmatprep.mubr.msk.f32.mxu0 %vm34_vm0, %v456_v0  ;;  %1135 = vmatpush3.msra.mxu0 %v968_v20 }
 0x33c   :  { %1116 = vmatmul.mubr.msk.f32.gmra.mxu0 %vm34_vm0, %v457_v1  ;;  %1136 = vmatprep.subr.mxu0 %v967_v21 }
 0x33d   :  { %1137 = vmatpush3.msra.mxu0 %v967_v21 }
 0x33e   :  { %1138 = vmatprep.subr.mxu0 %v966_v22 }
 0x33f   :  { %1139 = vmatpush3.msra.mxu0 %v966_v22 }
 0x3f8   :  { %v1114_v4 = vpop.f32.mrf.mxu0 }
 0x3f9   :  { %v552_v10 = vadd.f32 %v1114_v4, %v953_v6 }
 0x3fa   :  { %v546_v5 = vpop.f32.mrf.mxu0 }
 0x3fb   :  { %v547_v13 = vadd.f32 %v953_v6, %v546_v5  ;;  %v566_v15 = vmax.f32 %v552_v10, 0.0 }
 0x3fc   :  { %v1117_v7 = vpop.f32.mrf.mxu0 }
 0x3fd   :  { %v562_v8 = vadd.f32 %v1117_v7, %v953_v6  ;;  %v565_v16 = vmax.f32 %v547_v13, 0.0 }
 0x3fe   :  { %v556_v9 = vpop.f32.mrf.mxu0 }
 0x3ff   :  { %v568_v11 = vmax.f32 %v562_v8, 0.0  ;;  %v557_v12 = vadd.f32 %v953_v6, %v556_v9 }
 0x401   :  { %v567_v14 = vmax.f32 %v557_v12, 0.0  ;;  %1118 = vmatprep.subr.mxu1 %v568_v11 }
 0x402   :  { %1119 = vmatpush3.msra.mxu1 %v568_v11 }
 0x403   :  { %1120 = vmatprep.subr.mxu1 %v567_v14 }
 0x404   :  { %1121 = vmatpush3.msra.mxu1 %v567_v14 }
 0x405   :  { %1122 = vmatprep.subr.mxu1 %v566_v15 }
 0x406   :  { %1123 = vmatpush3.msra.mxu1 %v566_v15 }
 0x407   :  { %1124 = vmatprep.subr.mxu1 %v565_v16 }
 0x408   :  { %1125 = vmatpush3.msra.mxu1 %v565_v16 }
 0x409   :  { %1127 = vmatmul.mubr.msk.f32.vlgmr.msra.gmra.mxu1 %vm34_vm0, %v959_v17 }
 0x40a   :  { %1129 = vmatprep.mubr.msk.f32.mxu1 %vm34_vm0, %v960_v18 }
 0x40d   :  { %1130 = vmatmul.mubr.msk.f32.gmra.mxu1 %vm34_vm0, %v961_v19 }
 0x40e   :  { %1154 = vmatprep.mubr.msk.f32.mxu1 %vm34_vm0, %v975_v31 }
 0x4c9   :  { %v1128_v23 = vpop.f32.mrf.mxu1 }
 0x4ca   :  { %v672_v26 = vadd.f32 %v1128_v23, %v455_v61 }
 0x4cb   :  { %v652_v24 = vpop.f32.mrf.mxu1 }
 0x4cc   :  { %v671_v25 = vadd.f32 %v652_v24, %v454_v60 }
 0x4cd   :  { %v1131_v27 = vpop.f32.mrf.mxu1 }
 0x4ce   :  { %1140 = vmatprep.mubr.msk.f32.mxu0 %vm34_vm0, %v671_v25  ;;  %v674_v30 = vadd.f32 %v1131_v27, %v457_v1 }
 0x4cf   :  { %v662_v28 = vpop.f32.mrf.mxu1  ;;  %1141 = vmatmul.mubr.msk.f32.vlgmr.msra.gmra.mxu0 %vm34_vm0, %v672_v26 }
 0x4d0   :  { %v673_v29 = vadd.f32 %v662_v28, %v456_v0 }
 0x4d2   :  { %1143 = vmatprep.mubr.msk.f32.mxu0 %vm34_vm0, %v673_v29 }
 0x4d3   :  { %1144 = vmatmul.mubr.msk.f32.gmra.mxu0 %vm34_vm0, %v674_v30 }
 0x58f   :  { %v1142_v32 = vpop.f32.mrf.mxu0 }
 0x590   :  { %v769_v38 = vadd.f32 %v1142_v32, %v970_v34 }
 0x591   :  { %v763_v33 = vpop.f32.mrf.mxu0 }
 0x592   :  { %v764_v41 = vadd.f32 %v970_v34, %v763_v33  ;;  %v783_v43 = vmax.f32 %v769_v38, 0.0 }
 0x593   :  { %v1145_v35 = vpop.f32.mrf.mxu0 }
 0x594   :  { %v779_v36 = vadd.f32 %v1145_v35, %v970_v34  ;;  %v782_v44 = vmax.f32 %v764_v41, 0.0 }
 0x595   :  { %v773_v37 = vpop.f32.mrf.mxu0 }
 0x596   :  { %v785_v39 = vmax.f32 %v779_v36, 0.0  ;;  %v774_v40 = vadd.f32 %v970_v34, %v773_v37 }
 0x598   :  { %v784_v42 = vmax.f32 %v774_v40, 0.0  ;;  %1146 = vmatprep.subr.mxu1 %v785_v39 }
 0x599   :  { %1147 = vmatpush3.msra.mxu1 %v785_v39 }
 0x59a   :  { %1148 = vmatprep.subr.mxu1 %v784_v42 }
 0x59b   :  { %1149 = vmatpush3.msra.mxu1 %v784_v42 }
 0x59c   :  { %1150 = vmatprep.subr.mxu1 %v783_v43 }
 0x59d   :  { %1151 = vmatpush3.msra.mxu1 %v783_v43 }
 0x59e   :  { %1152 = vmatprep.subr.mxu1 %v782_v44 }
 0x59f   :  { %1153 = vmatpush3.msra.mxu1 %v782_v44 }
 0x5a0   :  { %1155 = vmatmul.mubr.msk.f32.vlgmr.msra.gmra.mxu1 %vm34_vm0, %v976_v45 }
 0x5a1   :  { %1157 = vmatprep.mubr.msk.f32.mxu1 %vm34_vm0, %v977_v46 }
 0x5a4   :  { %1158 = vmatmul.mubr.msk.f32.gmra.mxu1 %vm34_vm0, %v978_v47 }
 0x660   :  { %v1156_v48 = vpop.f32.mrf.mxu1 }
 0x661   :  { %v889_v50 = vadd.f32 %v1156_v48, %v672_v26 }
 0x662   :  { %v869_v51 = vpop.f32.mrf.mxu1 }
 0x663   :  { %v900_v52 = vadd.f32 %v983_v49, %v889_v50  ;;  %v888_v53 = vadd.f32 %v869_v51, %v671_v25 }
 0x664   :  { %v1159_v54 = vpop.f32.mrf.mxu1 }
 0x665   :  { %904 = vst.msk [vmem:[#allocation2 + $0x8] sm:$0xff] %vm34_vm0, %v900_v52  ;;  %v899_v55 = vadd.f32 %v983_v49, %v888_v53  ;;  %v891_v56 = vadd.f32 %v1159_v54, %v674_v30 }
 0x666   :  { %v879_v57 = vpop.f32.mrf.mxu1 }
 0x667   :  { %903 = vst.msk [vmem:[#allocation2] sm:$0xff] %vm34_vm0, %v899_v55  ;;  %v902_v58 = vadd.f32 %v983_v49, %v891_v56  ;;  %v890_v59 = vadd.f32 %v879_v57, %v673_v29 }
 0x669   :  { %906 = vst.msk [vmem:[#allocation2 + $0x18] sm:$0xff] %vm34_vm0, %v902_v58  ;;  %v901_v60 = vadd.f32 %v983_v49, %v890_v59 }
 0x66b   :  { %905 = vst.msk [vmem:[#allocation2 + $0x10] sm:$0xff] %vm34_vm0, %v901_v60 }
 0x66c   :  { %1174 = shalt.err (!%p1171_p4)
}
 0x66d   :  { %s1186_s4 = smov 128   ;;  %s1187_s22 = smov 8  }
 0x66e   :  { %918 = dma.vmem_to_hbm [thread:$0]  %s913_s21, 512, %s1385_s5, [#allocation3], %s1186_s4, %s1186_s4, %s1187_s22  }
 0x66f   :  { %1183 = dma.done.wait [#allocation3], 512  }
 0x670   :  { %1184 = vsyncadd [#allocation3], 4294966784 }
 0x671   :  { %922 = vsyncpa [#allocation3], 1 }

</bundles_post_ra>
